<compile_context>
chip_gen: v6e
topology: v6e:2x2x1
jax: 0.10.0
libtpu: 0.0.40
codegen_flags: <defaults>
</compile_context>

<pallas_src>
import jax
import jax.numpy as jnp
from jax.experimental import pallas as pl
from jax.experimental.pallas import tpu as pltpu

HIDDEN = 128
MAX_TB = 1024        # max batch rows per grid step (review: 1024-2048)
SMALL_BATCH = 512    # at/below this, single tile (pure latency path)
ROW_ALIGN = 16       # row multiple (bf16 sublane packing after in-kernel cast)


def _round_up(n, m):
    return ((n + m - 1) // m) * m


def dqn_kernel(x_ref, w1_ref, b1_ref, w2_ref, b2_ref, w3_ref, b3_ref, out_ref):
    # In-kernel cast of the streamed f32 tile to bf16 (hidden under DMA/MXU slack).
    x = x_ref[...].astype(jnp.bfloat16)
    # Layer 1: Linear(state_dim, 128) + ReLU   (bf16 matmul, f32 accumulate)
    h1 = jnp.dot(x, w1_ref[...], preferred_element_type=jnp.float32)
    h1 = jnp.maximum(h1 + b1_ref[...], 0.0).astype(jnp.bfloat16)
    # Layer 2: Linear(128, 128) + ReLU
    h2 = jnp.dot(h1, w2_ref[...], preferred_element_type=jnp.float32)
    h2 = jnp.maximum(h2 + b2_ref[...], 0.0).astype(jnp.bfloat16)
    # Layer 3: Linear(128, action_dim), no activation (narrow-N matmul; MXU pads internally)
    q = jnp.dot(h2, w3_ref[...], preferred_element_type=jnp.float32)
    out_ref[...] = (q + b3_ref[...]).astype(out_ref.dtype)


def _pick_tile(batch):
    """Adaptive batch tile: single small tile for latency, >=2 tiles for v7x
    megacore on replay-buffer batches, capped at MAX_TB."""
    b16 = _round_up(batch, ROW_ALIGN)
    if b16 <= SMALL_BATCH:
        return b16
    half = _round_up((b16 + 1) // 2, ROW_ALIGN)
    return min(MAX_TB, half)


def dqn_forward(x, params):
    """x: (B, state_dim) float32; params from init_params (bf16 weights, f32 biases)."""
    B, state_dim = x.shape
    action_dim = params["w3"].shape[1]

    tb = _pick_tile(B)
    n_tiles = pl.cdiv(_round_up(B, ROW_ALIGN), tb)
    Bp = n_tiles * tb
    x_p = jnp.pad(x, ((0, Bp - B), (0, 0)))          # f32; cast happens in-kernel

    const = lambda shape: pl.BlockSpec(shape, lambda i: (0,) * len(shape))

    out = pl.pallas_call(
        dqn_kernel,
        out_shape=jax.ShapeDtypeStruct((Bp, action_dim), jnp.float32),
        grid=(n_tiles,),
        in_specs=[
            pl.BlockSpec((tb, state_dim), lambda i: (i, 0)),   # x: streamed per tile
            const(params["w1"].shape),                         # weights/biases: VMEM-resident
            const(params["b1"].shape),
            const(params["w2"].shape),
            const(params["b2"].shape),
            const(params["w3"].shape),
            const(params["b3"].shape),
        ],
        out_specs=pl.BlockSpec((tb, action_dim), lambda i: (i, 0)),
        compiler_params=pltpu.CompilerParams(
            dimension_semantics=("parallel",)),                # shards tiles over 2 TCs on v7x
    )(x_p, params["w1"], params["b1"], params["w2"], params["b2"],
      params["w3"], params["b3"])

    return out[:B]


def init_params(key, state_dim, action_dim, hidden=HIDDEN):
    """PyTorch nn.Linear default init (U(-1/sqrt(fan_in), +1/sqrt(fan_in))),
    weights stored bf16 (MXU-native), biases f32, no output padding."""
    def linear(k, fan_in, fan_out):
        kw, kb = jax.random.split(k)
        bound = 1.0 / jnp.sqrt(fan_in)
        w = jax.random.uniform(kw, (fan_in, fan_out), jnp.float32, -bound, bound)
        b = jax.random.uniform(kb, (1, fan_out), jnp.float32, -bound, bound)
        return w, b

    k1, k2, k3 = jax.random.split(key, 3)
    w1, b1 = linear(k1, state_dim, hidden)
    w2, b2 = linear(k2, hidden, hidden)
    w3, b3 = linear(k3, hidden, action_dim)

    return {
        "w1": w1.astype(jnp.bfloat16), "b1": b1,
        "w2": w2.astype(jnp.bfloat16), "b2": b2,
        "w3": w3.astype(jnp.bfloat16), "b3": b3,
    }


def dqn_reference(x, p):
    """Pure-JAX reference mirroring the kernel's precision (bf16 MXU, f32 accum)."""
    xb = x.astype(jnp.bfloat16)
    h1 = jnp.maximum(
        jnp.dot(xb, p["w1"], preferred_element_type=jnp.float32) + p["b1"], 0.0
    ).astype(jnp.bfloat16)
    h2 = jnp.maximum(
        jnp.dot(h1, p["w2"], preferred_element_type=jnp.float32) + p["b2"], 0.0
    ).astype(jnp.bfloat16)
    return jnp.dot(h2, p["w3"], preferred_element_type=jnp.float32) + p["b3"]


if __name__ == "__main__":
    key = jax.random.PRNGKey(0)
    k_params, k_x = jax.random.split(key)

    batch = 8          # small batch of states (online action selection, single tile)
    state_dim = 32     # synthetic env.observation_space.shape[0]
    action_dim = 8     # synthetic env.action_space.n

    params = init_params(k_params, state_dim, action_dim)
    x = jax.random.normal(k_x, (batch, state_dim), jnp.float32)

    q_vals = dqn_forward(x, params)
    jax.block_until_ready(q_vals)

    ref = dqn_reference(x, params)
    assert q_vals.shape == (batch, action_dim)
    assert jnp.allclose(q_vals, ref, atol=1e-2, rtol=1e-2)

    # Replay-buffer-sized batch: non-multiple of 16, splits into 2 tiles
    # (exercises the multi-tile / megacore path).
    big_x = jax.random.normal(jax.random.PRNGKey(1), (1000, state_dim), jnp.float32)
    big_q = dqn_forward(big_x, params)
    jax.block_until_ready(big_q)
    assert big_q.shape == (1000, action_dim)
    assert jnp.allclose(big_q, dqn_reference(big_x, params), atol=1e-2, rtol=1e-2)

    # Large batch: multiple MAX_TB-sized tiles.
    huge_x = jax.random.normal(jax.random.PRNGKey(2), (3000, state_dim), jnp.float32)
    huge_q = dqn_forward(huge_x, params)
    jax.block_until_ready(huge_q)
    assert huge_q.shape == (3000, action_dim)
    assert jnp.allclose(huge_q, dqn_reference(huge_x, params), atol=1e-2, rtol=1e-2)

    print("KERNEL_OK")
</pallas_src>

<mosaic_0001>
module attributes {stable_mosaic.version = 11 : i64} {
  func.func @dqn_kernel(%arg0: i32, %arg1: memref<16x32xf32, #tpu.memory_space<vmem>>, %arg2: memref<32x128xbf16, #tpu.memory_space<vmem>>, %arg3: memref<1x128xf32, #tpu.memory_space<vmem>>, %arg4: memref<128x128xbf16, #tpu.memory_space<vmem>>, %arg5: memref<1x128xf32, #tpu.memory_space<vmem>>, %arg6: memref<128x8xbf16, #tpu.memory_space<vmem>>, %arg7: memref<1x8xf32, #tpu.memory_space<vmem>>, %arg8: memref<16x8xf32, #tpu.memory_space<vmem>>) attributes {dimension_semantics = [#tpu.dimension_semantics<parallel>], iteration_bounds = array<i64: 1>, scalar_prefetch = 0 : i64, scratch_operands = 0 : i64, tpu.core_type = #tpu.core_type<tc>, window_params = [{transform_indices = @transform_0, window_bounds = array<i64: 16, 32>}, {pipeline_mode = #tpu.pipeline_mode<synchronous>, transform_indices = @transform_1, window_bounds = array<i64: 32, 128>}, {pipeline_mode = #tpu.pipeline_mode<synchronous>, transform_indices = @transform_2, window_bounds = array<i64: 1, 128>}, {pipeline_mode = #tpu.pipeline_mode<synchronous>, transform_indices = @transform_3, window_bounds = array<i64: 128, 128>}, {pipeline_mode = #tpu.pipeline_mode<synchronous>, transform_indices = @transform_4, window_bounds = array<i64: 1, 128>}, {pipeline_mode = #tpu.pipeline_mode<synchronous>, transform_indices = @transform_5, window_bounds = array<i64: 128, 8>}, {pipeline_mode = #tpu.pipeline_mode<synchronous>, transform_indices = @transform_6, window_bounds = array<i64: 1, 8>}, {transform_indices = @transform_7, window_bounds = array<i64: 16, 8>}]} {
    %c0 = arith.constant 0 : index
    %c0_0 = arith.constant 0 : index
    %0 = vector.load %arg1[%c0, %c0_0] : memref<16x32xf32, #tpu.memory_space<vmem>>, vector<16x32xf32>
    %1 = arith.truncf %0 : vector<16x32xf32> to vector<16x32xbf16>
    %c0_1 = arith.constant 0 : index
    %c0_2 = arith.constant 0 : index
    %2 = vector.load %arg2[%c0_1, %c0_2] : memref<32x128xbf16, #tpu.memory_space<vmem>>, vector<32x128xbf16>
    %cst = arith.constant dense<0.000000e+00> : vector<16x128xf32>
    %3 = tpu.matmul %1, %2, %cst {dimension_numbers = #tpu.dot_dimension_numbers<[1], [0], [0], [1], [0, 0, 1, 1], [], []>} : vector<16x32xbf16>, vector<32x128xbf16>, vector<16x128xf32> -> vector<16x128xf32>
    %c0_3 = arith.constant 0 : index
    %c0_4 = arith.constant 0 : index
    %4 = vector.load %arg3[%c0_3, %c0_4] : memref<1x128xf32, #tpu.memory_space<vmem>>, vector<1x128xf32>
    %5 = vector.broadcast %4 : vector<1x128xf32> to vector<16x128xf32>
    %6 = arith.addf %3, %5 : vector<16x128xf32>
    %cst_5 = arith.constant 0.000000e+00 : f32
    %7 = vector.broadcast %cst_5 : f32 to vector<16x128xf32>
    %8 = arith.maximumf %6, %7 : vector<16x128xf32>
    %9 = arith.truncf %8 : vector<16x128xf32> to vector<16x128xbf16>
    %c0_6 = arith.constant 0 : index
    %c0_7 = arith.constant 0 : index
    %10 = vector.load %arg4[%c0_6, %c0_7] : memref<128x128xbf16, #tpu.memory_space<vmem>>, vector<128x128xbf16>
    %cst_8 = arith.constant dense<0.000000e+00> : vector<16x128xf32>
    %11 = tpu.matmul %9, %10, %cst_8 {dimension_numbers = #tpu.dot_dimension_numbers<[1], [0], [0], [1], [0, 0, 1, 1], [], []>} : vector<16x128xbf16>, vector<128x128xbf16>, vector<16x128xf32> -> vector<16x128xf32>
    %c0_9 = arith.constant 0 : index
    %c0_10 = arith.constant 0 : index
    %12 = vector.load %arg5[%c0_9, %c0_10] : memref<1x128xf32, #tpu.memory_space<vmem>>, vector<1x128xf32>
    %13 = vector.broadcast %12 : vector<1x128xf32> to vector<16x128xf32>
    %14 = arith.addf %11, %13 : vector<16x128xf32>
    %cst_11 = arith.constant 0.000000e+00 : f32
    %15 = vector.broadcast %cst_11 : f32 to vector<16x128xf32>
    %16 = arith.maximumf %14, %15 : vector<16x128xf32>
    %17 = arith.truncf %16 : vector<16x128xf32> to vector<16x128xbf16>
    %c0_12 = arith.constant 0 : index
    %c0_13 = arith.constant 0 : index
    %18 = vector.load %arg6[%c0_12, %c0_13] : memref<128x8xbf16, #tpu.memory_space<vmem>>, vector<128x8xbf16>
    %cst_14 = arith.constant dense<0.000000e+00> : vector<16x8xf32>
    %19 = tpu.matmul %17, %18, %cst_14 {dimension_numbers = #tpu.dot_dimension_numbers<[1], [0], [0], [1], [0, 0, 1, 1], [], []>} : vector<16x128xbf16>, vector<128x8xbf16>, vector<16x8xf32> -> vector<16x8xf32>
    %c0_15 = arith.constant 0 : index
    %c0_16 = arith.constant 0 : index
    %20 = vector.load %arg7[%c0_15, %c0_16] : memref<1x8xf32, #tpu.memory_space<vmem>>, vector<1x8xf32>
    %21 = vector.broadcast %20 : vector<1x8xf32> to vector<16x8xf32>
    %22 = arith.addf %19, %21 : vector<16x8xf32>
    %c0_17 = arith.constant 0 : index
    %c0_18 = arith.constant 0 : index
    %23 = vector.load %arg8[%c0_17, %c0_18] : memref<16x8xf32, #tpu.memory_space<vmem>>, vector<16x8xf32>
    tpu.vector_store %arg8[%c0_17, %c0_18], %22 {strides = array<i32>} : memref<16x8xf32, #tpu.memory_space<vmem>>, vector<16x8xf32>,
    return
  }
  func.func @transform_0(%arg0: i32) -> (i32, i32) {
    %c0_i32 = arith.constant 0 : i32
    %c0_i32_0 = arith.constant 0 : i32
    return %arg0, %c0_i32 : i32, i32
  }
  func.func @transform_1(%arg0: i32) -> (i32, i32) {
    %c0_i32 = arith.constant 0 : i32
    %c0_i32_0 = arith.constant 0 : i32
    %c0_i32_1 = arith.constant 0 : i32
    return %c0_i32, %c0_i32_0 : i32, i32
  }
  func.func @transform_2(%arg0: i32) -> (i32, i32) {
    %c0_i32 = arith.constant 0 : i32
    %c0_i32_0 = arith.constant 0 : i32
    %c0_i32_1 = arith.constant 0 : i32
    return %c0_i32, %c0_i32_0 : i32, i32
  }
  func.func @transform_3(%arg0: i32) -> (i32, i32) {
    %c0_i32 = arith.constant 0 : i32
    %c0_i32_0 = arith.constant 0 : i32
    %c0_i32_1 = arith.constant 0 : i32
    return %c0_i32, %c0_i32_0 : i32, i32
  }
  func.func @transform_4(%arg0: i32) -> (i32, i32) {
    %c0_i32 = arith.constant 0 : i32
    %c0_i32_0 = arith.constant 0 : i32
    %c0_i32_1 = arith.constant 0 : i32
    return %c0_i32, %c0_i32_0 : i32, i32
  }
  func.func @transform_5(%arg0: i32) -> (i32, i32) {
    %c0_i32 = arith.constant 0 : i32
    %c0_i32_0 = arith.constant 0 : i32
    %c0_i32_1 = arith.constant 0 : i32
    return %c0_i32, %c0_i32_0 : i32, i32
  }
  func.func @transform_6(%arg0: i32) -> (i32, i32) {
    %c0_i32 = arith.constant 0 : i32
    %c0_i32_0 = arith.constant 0 : i32
    %c0_i32_1 = arith.constant 0 : i32
    return %c0_i32, %c0_i32_0 : i32, i32
  }
  func.func @transform_7(%arg0: i32) -> (i32, i32) {
    %c0_i32 = arith.constant 0 : i32
    %c0_i32_0 = arith.constant 0 : i32
    return %arg0, %c0_i32 : i32, i32
  }
}

</mosaic_0001>

<bundles_post_ra>
// kernel: tpu_custom_call.1
= control target key start
LH: loop header
LB: loop body
LE: loop exit
PB: predicated region body
PF: predicated region fallthrough
CT: control target
= control target key end

     0   :  { %12 = vsyncpa [#allocation3], 0  ;;  %s667_s0 = inlined_call_operand.hbm [shape: f32[16,32], index: 0, kind: input, shape index: {}]   ;;  %s668_s1 = inlined_call_operand.hbm [shape: bf16[32,128], index: 1, kind: input, shape index: {}]   ;;  %s669_s2 = inlined_call_operand.vmem [shape: f32[1,128], index: 2, kind: input, shape index: {}]   ;;  %s670_s3 = inlined_call_operand.vmem [shape: bf16[128,128], index: 3, kind: input, shape index: {}]   ;;  %s671_s4 = inlined_call_operand.vmem [shape: f32[1,128], index: 4, kind: input, shape index: {}]   ;;  %s672_s5 = inlined_call_operand.vmem [shape: bf16[128,8], index: 5, kind: input, shape index: {}]   ;;  %s673_s6 = inlined_call_operand.vmem [shape: f32[1,8], index: 6, kind: input, shape index: {}]   ;;  %s674_s7 = inlined_call_operand.vmem [shape: f32[16,8], index: 7, kind: output, shape index: {}]  }
   0x1   :  { %13 = vsyncpa [#allocation5], 0  ;;  %s526_s24 = smov [#allocation2]  }
   0x2   :  { %s19_s25 = sshll.u32 %s526_s24, 4  ;;  %s20_s25 = int_to_ptr.vmem [resolvable:$true] %s19_s25 }
   0x3   :  { %s490_s26 = scalar_lea.vmem %s20_s25, 256  ;;  %p495_p1 = scmp.lt.s32.totalorder %s20_s25, %s20_s25 }
   0x4   :  { %p491_p0 = scmp.ne.s32.totalorder %s20_s25, %s490_s26  ;;  %p496_p2 = scmp.lt.s32.totalorder %s490_s26, %s490_s26 }
   0x6   :  { %p497_p3 = por %p496_p2, %p495_p1 }
   0x8   :  { %p498_p4 = pnand %p497_p3, %p491_p0 }
   0xa   :  { %501 = shalt.err (!%p498_p4)
}
   0xb   :  { %s527_s27 = smov 128   ;;  %s528_s28 = smov 8  }
   0xc   :  { %25 = dma.hbm_to_vmem [thread:$0]  %s667_s0, 256, %s20_s25, [#allocation3], %s527_s27, %s527_s27, %s528_s28  }
   0xd   :  { %s529_s8 = smov [#allocation4]  }
   0xe   :  { %s31_s9 = sshll.u32 %s529_s8, 4  ;;  %s32_s9 = int_to_ptr.vmem [resolvable:$true] %s31_s9 }
   0xf   :  { %s510_s10 = scalar_lea.vmem %s32_s9, 256  ;;  %p515_p6 = scmp.lt.s32.totalorder %s32_s9, %s32_s9 }
  0x10   :  { %p511_p5 = scmp.ne.s32.totalorder %s32_s9, %s510_s10  ;;  %p516_p7 = scmp.lt.s32.totalorder %s510_s10, %s510_s10 }
  0x12   :  { %p517_p8 = por %p516_p7, %p515_p6 }
  0x14   :  { %p518_p9 = pnand %p517_p8, %p511_p5 }
  0x16   :  { %521 = shalt.err (!%p518_p9)
}
  0x17   :  { %s530_s11 = smov 64   ;;  %s531_s12 = smov 4  }
  0x18   :  { %37 = dma.hbm_to_vmem [thread:$0]  %s668_s1, 256, %s32_s9, [#allocation5], %s530_s11, %s530_s11, %s531_s12  }
  0x19   :  { %522 = dma.done.wait [#allocation3], 256  }
  0x1a   :  { %523 = vsyncadd [#allocation3], 4294967040 }
  0x1b   :  { %524 = dma.done.wait [#allocation5], 256  }
  0x1c   :  { %525 = vsyncadd [#allocation5], 4294967040  ;;  %v532_v0 = vmov 0.0   ;;  %vm533_vm0 = vmmov 0   ;;  %v464_v1 = vld [vmem:[#allocation4 + $0x8] sm:$0xff]   ;;  %v465_v2 = vld [vmem:[#allocation4] sm:$0xff]  }
  0x1d   :  { %408 = vmatprep.subr.bf16.mxu0 %v532_v0  ;;  %412 = vmatprep.mubr.msk.bf16.mxu0 %vm533_vm0, %v532_v0  ;;  %v55_v3 = vld [vmem:[#allocation2] sm:$0xff]  ;;  %v56_v4 = vld [vmem:[#allocation2 + $0x8] sm:$0xff]  ;;  %v466_v5 = vld [vmem:[%s670_s3 + $0x38] sm:$0xff]   ;;  %vm81_vm1 = vcmask 261120   ;;  %vm356_vm2 = vcmask 64512  }
  0x1e   :  { %416 = vmatprep.subr.bf16.mxu1 %v532_v0  ;;  %432 = vmatprep.mubr.msk.bf16.mxu1 %vm533_vm0, %v532_v0  ;;  %v57_v6 = vpack.c.bf16 %v56_v4, %v55_v3  ;;  %v467_v7 = vld [vmem:[%s670_s3 + $0x30] sm:$0xff]   ;;  %v468_v8 = vld [vmem:[%s670_s3 + $0x28] sm:$0xff]   ;;  %v469_v9 = vld [vmem:[%s670_s3 + $0x20] sm:$0xff]  }
  0x1f   :  { %409 = vmatpush3.bf16.msra.mxu0 %v464_v1  ;;  %417 = vmatpush3.bf16.msra.mxu1 %v466_v5  ;;  %v470_v10 = vld [vmem:[%s670_s3 + $0x18] sm:$0xff]   ;;  %v471_v11 = vld [vmem:[%s670_s3 + $0x10] sm:$0xff]   ;;  %v472_v12 = vld [vmem:[%s670_s3 + $0x8] sm:$0xff]  }
  0x20   :  { %410 = vmatprep.subr.bf16.mxu0 %v532_v0  ;;  %418 = vmatprep.subr.bf16.mxu1 %v532_v0  ;;  %v473_v13 = vld [vmem:[%s670_s3] sm:$0xff]   ;;  %v474_v14 = vld [vmem:[%s672_s5 + $0x38] sm:$0xff]   ;;  %v475_v15 = vld [vmem:[%s672_s5 + $0x30] sm:$0xff]  }
  0x21   :  { %v476_v16 = vld [vmem:[%s672_s5 + $0x28] sm:$0xff]   ;;  %v477_v17 = vld [vmem:[%s672_s5 + $0x20] sm:$0xff]   ;;  %v478_v18 = vld [vmem:[%s672_s5 + $0x18] sm:$0xff]  }
  0x22   :  { %v365_v19 = vld [vmem:[%s669_s2] ss:$0 sm:$0xff]  ;;  %v479_v29 = vld [vmem:[%s672_s5 + $0x10] sm:$0xff]   ;;  %v480_v30 = vld [vmem:[%s672_s5 + $0x8] sm:$0xff]  }
  0x23   :  { %411 = vmatpush3.bf16.msra.mxu0 %v465_v2  ;;  %419 = vmatpush3.bf16.msra.mxu1 %v467_v7  ;;  %v481_v31 = vld [vmem:[%s672_s5] sm:$0xff]  }
  0x24   :  { %436 = vmatprep.subr.bf16.mxu0 %v532_v0  ;;  %420 = vmatprep.subr.bf16.mxu1 %v532_v0  ;;  %v369_v32 = vld [vmem:[%s671_s4] ss:$0 sm:$0xff] }
  0x25   :  { %v378_v42 = vld [vmem:[%s673_s6] ss:$0 sm:$0xff] }
  0x26   :  { %413 = vmatmul.mubr.msk.bf16.vlgmr.msra.gmra.mxu0 %vm81_vm1, %v57_v6 }
  0x27   :  { %452 = vmatprep.mubr.msk.bf16.mxu0 %vm533_vm0, %v532_v0  ;;  %421 = vmatpush3.bf16.msra.mxu1 %v468_v8 }
  0x28   :  { %422 = vmatprep.subr.bf16.mxu1 %v532_v0  ;;  %437 = vmatpush3.bf16.msra.mxu0 %v474_v14 }
  0x29   :  { %438 = vmatprep.subr.bf16.mxu0 %v532_v0 }
  0x2b   :  { %423 = vmatpush3.bf16.msra.mxu1 %v469_v9 }
  0x2c   :  { %424 = vmatprep.subr.bf16.mxu1 %v532_v0  ;;  %439 = vmatpush3.bf16.msra.mxu0 %v475_v15 }
  0x2d   :  { %440 = vmatprep.subr.bf16.mxu0 %v532_v0 }
  0x2f   :  { %425 = vmatpush3.bf16.msra.mxu1 %v470_v10 }
  0x30   :  { %426 = vmatprep.subr.bf16.mxu1 %v532_v0  ;;  %441 = vmatpush3.bf16.msra.mxu0 %v476_v16 }
  0x31   :  { %442 = vmatprep.subr.bf16.mxu0 %v532_v0 }
  0x33   :  { %427 = vmatpush3.bf16.msra.mxu1 %v471_v11 }
  0x34   :  { %428 = vmatprep.subr.bf16.mxu1 %v532_v0  ;;  %443 = vmatpush3.bf16.msra.mxu0 %v477_v17 }
  0x35   :  { %444 = vmatprep.subr.bf16.mxu0 %v532_v0 }
  0x37   :  { %429 = vmatpush3.bf16.msra.mxu1 %v472_v12 }
  0x38   :  { %430 = vmatprep.subr.bf16.mxu1 %v532_v0  ;;  %445 = vmatpush3.bf16.msra.mxu0 %v478_v18 }
  0x39   :  { %446 = vmatprep.subr.bf16.mxu0 %v532_v0 }
  0x3b   :  { %431 = vmatpush3.bf16.msra.mxu1 %v473_v13 }
  0x3c   :  { %447 = vmatpush3.bf16.msra.mxu0 %v479_v29 }
  0x3d   :  { %448 = vmatprep.subr.bf16.mxu0 %v532_v0 }
  0x40   :  { %449 = vmatpush3.bf16.msra.mxu0 %v480_v30 }
  0x41   :  { %450 = vmatprep.subr.bf16.mxu0 %v532_v0 }
  0x44   :  { %451 = vmatpush3.bf16.msra.mxu0 %v481_v31 }
  0xe6   :  { %v119_v20 = vpop.f32.mrf.mxu0 }
  0xe7   :  { %v120_v22 = vadd.f32 %v365_v19, %v119_v20 }
  0xe8   :  { %v414_v21 = vpop.f32.mrf.mxu0 }
  0xe9   :  { %v126_v26 = vmax.f32 %v120_v22, 0.0 }
  0xea   :  { %v122_v23 = vpop.f32.mrf.mxu0 }
  0xeb   :  { %v123_v24 = vadd.f32 %v365_v19, %v122_v23 }
  0xec   :  { %v415_v25 = vpop.f32.mrf.mxu0 }
  0xed   :  { %v127_v27 = vmax.f32 %v123_v24, 0.0 }
  0xef   :  { %v128_v28 = vpack.c.bf16 %v127_v27, %v126_v26 }
  0xf1   :  { %433 = vmatmul.mubr.bf16.vlgmr.msra.gmra.mxu1 %v128_v28 }
 0x1b1   :  { %v234_v33 = vpop.f32.mrf.mxu1 }
 0x1b2   :  { %v235_v35 = vadd.f32 %v369_v32, %v234_v33 }
 0x1b3   :  { %v434_v34 = vpop.f32.mrf.mxu1 }
 0x1b4   :  { %v241_v39 = vmax.f32 %v235_v35, 0.0 }
 0x1b5   :  { %v237_v36 = vpop.f32.mrf.mxu1 }
 0x1b6   :  { %v238_v37 = vadd.f32 %v369_v32, %v237_v36 }
 0x1b7   :  { %v435_v38 = vpop.f32.mrf.mxu1 }
 0x1b8   :  { %v242_v40 = vmax.f32 %v238_v37, 0.0 }
 0x1ba   :  { %v243_v41 = vpack.c.bf16 %v242_v40, %v241_v39 }
 0x1bc   :  { %453 = vmatmul.mubr.bf16.vlgmr.msra.gmra.mxu0 %v243_v41 }
 0x27c   :  { %v349_v43 = vpop.f32.mrf.mxu0 }
 0x27d   :  { %v350_v44 = vadd.f32 %v378_v42, %v349_v43 }
 0x27e   :  { %v454_v45 = vpop.f32.mrf.mxu0 }
 0x27f   :  { %357 = vst.msk [vmem:[%s674_s7] sm:$0xff] %vm356_vm2, %v350_v44 }
 0x280   :  { %v352_v46 = vpop.f32.mrf.mxu0 }
 0x281   :  { %v353_v47 = vadd.f32 %v378_v42, %v352_v46 }
 0x282   :  { %v455_v48 = vpop.f32.mrf.mxu0 }
 0x283   :  { %358 = vst.msk [vmem:[%s674_s7 + $0x8] sm:$0xff] %vm356_vm2, %v353_v47 }
 0x284   :  { %363 = vsyncpa [#allocation3], 1 }
 0x285   :  { %364 = vsyncpa [#allocation5], 1 }

</bundles_post_ra>
